<compile_context>
chip_gen: v5e
topology: v5e:2x2
jax: 0.10.0
libtpu: 0.0.40
codegen_flags: <defaults>
</compile_context>

<pallas_src>
import jax
import jax.numpy as jnp
from jax.experimental import pallas as pl
from jax.experimental.pallas import tpu as pltpu


# ---------------- pass 1: batched input projection (no time dependence) ----------------
def xproj_kernel(x_ref, w_ref, b_ref, o_ref):
    o_ref[...] = (jnp.dot(x_ref[...], w_ref[...], preferred_element_type=jnp.float32)
                  + b_ref[...])


# ---------------- pass 2: LSTM recurrence over a block of TT timesteps ----------------
def lstm_kernel(gx_ref, whh_ref, h_out_ref, h_scr, c_scr):
    # gx_ref : (TT, 4, Bn, H)   precomputed x-path gates (i, f, g, o) + both biases
    # whh_ref: (4, H, H)        recurrent weights stacked per gate
    # h_out  : (TT, Bn, H)
    @pl.when(pl.program_id(0) == 0)
    def _():
        h_scr[...] = jnp.zeros_like(h_scr)
        c_scr[...] = jnp.zeros_like(c_scr)

    w_i = whh_ref[0]
    w_f = whh_ref[1]
    w_g = whh_ref[2]
    w_o = whh_ref[3]
    TT = h_out_ref.shape[0]

    def step(tt, carry):
        g_t = gx_ref[tt]                       # (4, Bn, H) -- gate axis is free (vreg select)
        h = h_scr[...]
        c = c_scr[...]
        i_g = jax.nn.sigmoid(g_t[0] + jnp.dot(h, w_i, preferred_element_type=jnp.float32))
        f_g = jax.nn.sigmoid(g_t[1] + jnp.dot(h, w_f, preferred_element_type=jnp.float32))
        g_g = jnp.tanh(g_t[2] + jnp.dot(h, w_g, preferred_element_type=jnp.float32))
        o_g = jax.nn.sigmoid(g_t[3] + jnp.dot(h, w_o, preferred_element_type=jnp.float32))
        c_new = f_g * c + i_g * g_g
        h_new = o_g * jnp.tanh(c_new)
        c_scr[...] = c_new
        h_scr[...] = h_new
        h_out_ref[tt] = h_new
        return carry

    jax.lax.fori_loop(0, TT, step, 0, unroll=True)


# ---------------- pass 3: fused readout+decoder -> log_softmax -> masked NLL ----------------
def head_kernel(h_ref, w_ref, b_ref, yid_ref, ym_ref, probs_ref, nll_ref):
    logits = (jnp.dot(h_ref[...], w_ref[...], preferred_element_type=jnp.float32)
              + b_ref[...])                                        # (TM, V)
    m = jnp.max(logits, axis=-1, keepdims=True)
    z = logits - m
    logp = z - jnp.log(jnp.sum(jnp.exp(z), axis=-1, keepdims=True))
    probs_ref[...] = logp
    # masked NLL via lane-iota == target (no one-hot input)
    lane = jax.lax.broadcasted_iota(jnp.int32, logp.shape, 1)
    picked = jnp.sum(jnp.where(lane == yid_ref[...], logp, 0.0), axis=-1, keepdims=True)
    nll_ref[...] = (-picked) * ym_ref[...]
    # TODO(synk): for realistic vocab sizes, tile V (grid axis + online logsumexp) so the
    # decoder weights / logits never have to fit VMEM whole (v7x 64 MiB VMEM).


def _pick_tile(n, candidates):
    for c in candidates:
        if n % c == 0:
            return c
    return n


def lm2_forward_pallas(x_emb, params, y_ids, y_mask):
    Tx, Bn, E = x_emb.shape
    H = params["w_hh"].shape[0]
    V = params["w_dec"].shape[1]
    M = Tx * Bn
    assert M % 8 == 0, "pad Tx*Bn to a multiple of 8"
    assert V % 128 == 0, "pad vocab to a multiple of 128"

    # ----- pass 1: gates_x = x @ W_ih + (b_ih + b_hh), one big parallel matmul -----
    b_comb = params["b_ih"] + params["b_hh"]                       # pre-summed bias
    x_flat = x_emb.reshape(M, E)
    TMx = _pick_tile(M, (512, 256, 128, 64, 32, 16, 8))
    gx_flat = pl.pallas_call(
        xproj_kernel,
        out_shape=jax.ShapeDtypeStruct((M, 4 * H), jnp.float32),
        grid_spec=pltpu.PrefetchScalarGridSpec(
            num_scalar_prefetch=0,
            grid=(M // TMx,),
            in_specs=[
                pl.BlockSpec((TMx, E), lambda i: (i, 0)),
                pl.BlockSpec((E, 4 * H), lambda i: (0, 0)),
                pl.BlockSpec((1, 4 * H), lambda i: (0, 0)),
            ],
            out_specs=pl.BlockSpec((TMx, 4 * H), lambda i: (i, 0)),
        ),
        compiler_params=pltpu.CompilerParams(dimension_semantics=("parallel",)),
    )(x_flat, params["w_ih"], b_comb)

    # Put the gate index on its own axis so the recurrent kernel never lane-slices.
    gx = gx_flat.reshape(Tx, Bn, 4, H).transpose(0, 2, 1, 3)        # (Tx, 4, Bn, H)
    w_hh_g = params["w_hh"].reshape(H, 4, H).transpose(1, 0, 2)     # (4, H, H)

    # ----- pass 2: serial recurrence, time-blocked grid -----
    TT = _pick_tile(Tx, (16, 8, 4, 2, 1))
    h_all = pl.pallas_call(
        lstm_kernel,
        out_shape=jax.ShapeDtypeStruct((Tx, Bn, H), jnp.float32),
        grid_spec=pltpu.PrefetchScalarGridSpec(
            num_scalar_prefetch=0,
            grid=(Tx // TT,),
            in_specs=[
                pl.BlockSpec((TT, 4, Bn, H), lambda t: (t, 0, 0, 0)),
                pl.BlockSpec((4, H, H), lambda t: (0, 0, 0)),
            ],
            out_specs=pl.BlockSpec((TT, Bn, H), lambda t: (t, 0, 0)),
            scratch_shapes=[
                pltpu.VMEM((Bn, H), jnp.float32),                   # h carry
                pltpu.VMEM((Bn, H), jnp.float32),                   # c carry
            ],
        ),
        compiler_params=pltpu.CompilerParams(dimension_semantics=("arbitrary",)),
    )(gx, w_hh_g)

    # ----- pass 3: fused readout + tied decoder (offline fuse, eval mode) -----
    w_fused = params["w_ro"] @ params["w_dec"]                      # (H, V)
    b_fused = params["b_ro"] @ params["w_dec"] + params["b_dec"]    # (1, V)

    h_flat = h_all.reshape(M, H)
    yid2 = y_ids.reshape(M, 1).astype(jnp.int32)
    ym2 = y_mask.reshape(M, 1).astype(jnp.float32)
    TM = _pick_tile(M, (256, 128, 64, 32, 16, 8))
    probs, nll = pl.pallas_call(
        head_kernel,
        out_shape=(
            jax.ShapeDtypeStruct((M, V), jnp.float32),
            jax.ShapeDtypeStruct((M, 1), jnp.float32),
        ),
        grid_spec=pltpu.PrefetchScalarGridSpec(
            num_scalar_prefetch=0,
            grid=(M // TM,),
            in_specs=[
                pl.BlockSpec((TM, H), lambda i: (i, 0)),
                pl.BlockSpec((H, V), lambda i: (0, 0)),
                pl.BlockSpec((1, V), lambda i: (0, 0)),
                pl.BlockSpec((TM, 1), lambda i: (i, 0)),            # int32 target ids
                pl.BlockSpec((TM, 1), lambda i: (i, 0)),            # f32 mask
            ],
            out_specs=(
                pl.BlockSpec((TM, V), lambda i: (i, 0)),            # log-probs
                pl.BlockSpec((TM, 1), lambda i: (i, 0)),            # per-row masked NLL
            ),
        ),
        compiler_params=pltpu.CompilerParams(dimension_semantics=("parallel",)),
    )(h_flat, w_fused, b_fused, yid2, ym2)

    loss = jnp.sum(nll)          # tiny wrapper-side reductions (M floats)
    n_words = jnp.sum(ym2)
    return loss, n_words, probs


def lm2_reference(x_emb, params, y_data, y_mask):
    """Plain-JAX reference mirroring the PyTorch forward (eval mode)."""
    Tx, Bn, E = x_emb.shape
    H = params["w_hh"].shape[0]

    def step(carry, x_t):
        h, c = carry
        gates = (x_t @ params["w_ih"] + h @ params["w_hh"]
                 + params["b_ih"][0] + params["b_hh"][0])
        i = jax.nn.sigmoid(gates[:, :H])
        f = jax.nn.sigmoid(gates[:, H:2 * H])
        g = jnp.tanh(gates[:, 2 * H:3 * H])
        o = jax.nn.sigmoid(gates[:, 3 * H:])
        c = f * c + i * g
        h = o * jnp.tanh(c)
        return (h, c), h

    init = (jnp.zeros((Bn, H), jnp.float32), jnp.zeros((Bn, H), jnp.float32))
    _, hs = jax.lax.scan(step, init, x_emb)                          # (Tx, Bn, H)
    out = hs @ params["w_ro"] + params["b_ro"][0]
    logit = out @ params["w_dec"] + params["b_dec"][0]
    logp = jax.nn.log_softmax(logit, axis=-1).reshape(Tx * Bn, -1)
    y = y_data.reshape(-1)
    m = y_mask.reshape(-1)
    nll = -logp[jnp.arange(Tx * Bn), y]
    return jnp.sum(nll * m), jnp.sum(m), logp


if __name__ == "__main__":
    # Small synthetic config: vocab V=128, dim_wemb E=32, dim_enc H=32,
    # sequence length T=9 (Tx = 8 after the shift), batch Bn=8.
    V, E, H, T, Bn = 128, 32, 32, 9, 8

    key = jax.random.PRNGKey(0)
    k_emb, k_ih, k_hh, k_ro, k_bih, k_bhh, k_bro, k_bdec, k_data, k_mask = (
        jax.random.split(key, 10))

    # Deterministic parameters (PyTorch-shaped, then transposed to (in, out)).
    emb = jax.random.normal(k_emb, (V, E), jnp.float32) * 0.1          # src_emb.weight
    w_ih_t = jax.random.normal(k_ih, (4 * H, E), jnp.float32) * 0.1    # LSTM weight_ih_l0
    w_hh_t = jax.random.normal(k_hh, (4 * H, H), jnp.float32) * 0.1    # LSTM weight_hh_l0
    w_ro_t = jax.random.normal(k_ro, (E, H), jnp.float32) * 0.1        # readout.weight
    params = {
        "w_ih": w_ih_t.T,                                              # (E, 4H)
        "b_ih": (jax.random.normal(k_bih, (4 * H,), jnp.float32) * 0.1).reshape(1, -1),
        "w_hh": w_hh_t.T,                                              # (H, 4H)
        "b_hh": (jax.random.normal(k_bhh, (4 * H,), jnp.float32) * 0.1).reshape(1, -1),
        "w_ro": w_ro_t.T,                                              # (H, E)
        "b_ro": (jax.random.normal(k_bro, (E,), jnp.float32) * 0.1).reshape(1, -1),
        "w_dec": emb.T,                                                # tied: (E, V)
        "b_dec": (jax.random.normal(k_bdec, (V,), jnp.float32) * 0.1).reshape(1, -1),
    }

    # data / mask as in the PyTorch forward (mask branch).
    data = jax.random.randint(k_data, (T, Bn), 0, V)                   # token ids (T, Bn)
    mask = (jax.random.uniform(k_mask, (T, Bn)) > 0.2).astype(jnp.float32)

    x_data = data[:-1]                                                 # (Tx, Bn)
    y_data = data[1:]                                                  # (Tx, Bn)
    y_mask = mask[1:]                                                  # (Tx, Bn)

    # Glue: embedding gather (table lookup) stays in XLA; heavy math is in the kernels.
    x_emb = emb[x_data]                                                # (Tx, Bn, E)

    loss, n_words, probs = lm2_forward_pallas(x_emb, params, y_data, y_mask)
    jax.block_until_ready((loss, n_words, probs))

    loss_ref, nw_ref, probs_ref = lm2_reference(x_emb, params, y_data, y_mask)
    assert jnp.allclose(probs, probs_ref, atol=1e-4, rtol=1e-4), "log-probs mismatch"
    assert jnp.allclose(loss, loss_ref, atol=1e-3, rtol=1e-4), "loss mismatch"
    assert jnp.allclose(n_words, nw_ref), "n_words mismatch"

    print("KERNEL_OK")
</pallas_src>

<mosaic_0001>
module attributes {stable_mosaic.version = 11 : i64} {
  func.func @xproj_kernel(%arg0: i32, %arg1: memref<64x32xf32, #tpu.memory_space<vmem>>, %arg2: memref<32x128xf32, #tpu.memory_space<vmem>>, %arg3: memref<1x128xf32, #tpu.memory_space<vmem>>, %arg4: memref<64x128xf32, #tpu.memory_space<vmem>>) attributes {dimension_semantics = [#tpu.dimension_semantics<parallel>], iteration_bounds = array<i64: 1>, scalar_prefetch = 0 : i64, scratch_operands = 0 : i64, tpu.core_type = #tpu.core_type<tc>, window_params = [{transform_indices = @transform_0, window_bounds = array<i64: 64, 32>}, {pipeline_mode = #tpu.pipeline_mode<synchronous>, transform_indices = @transform_1, window_bounds = array<i64: 32, 128>}, {pipeline_mode = #tpu.pipeline_mode<synchronous>, transform_indices = @transform_2, window_bounds = array<i64: 1, 128>}, {transform_indices = @transform_3, window_bounds = array<i64: 64, 128>}]} {
    %c0 = arith.constant 0 : index
    %c0_0 = arith.constant 0 : index
    %0 = vector.load %arg1[%c0, %c0_0] : memref<64x32xf32, #tpu.memory_space<vmem>>, vector<64x32xf32>
    %c0_1 = arith.constant 0 : index
    %c0_2 = arith.constant 0 : index
    %1 = vector.load %arg2[%c0_1, %c0_2] : memref<32x128xf32, #tpu.memory_space<vmem>>, vector<32x128xf32>
    %cst = arith.constant dense<0.000000e+00> : vector<64x128xf32>
    %2 = tpu.matmul %0, %1, %cst {dimension_numbers = #tpu.dot_dimension_numbers<[1], [0], [0], [1], [0, 0, 1, 1], [], []>} : vector<64x32xf32>, vector<32x128xf32>, vector<64x128xf32> -> vector<64x128xf32>
    %c0_3 = arith.constant 0 : index
    %c0_4 = arith.constant 0 : index
    %3 = vector.load %arg3[%c0_3, %c0_4] : memref<1x128xf32, #tpu.memory_space<vmem>>, vector<1x128xf32>
    %4 = vector.broadcast %3 : vector<1x128xf32> to vector<64x128xf32>
    %5 = arith.addf %2, %4 : vector<64x128xf32>
    %c0_5 = arith.constant 0 : index
    %c0_6 = arith.constant 0 : index
    %6 = vector.load %arg4[%c0_5, %c0_6] : memref<64x128xf32, #tpu.memory_space<vmem>>, vector<64x128xf32>
    tpu.vector_store %arg4[%c0_5, %c0_6], %5 {strides = array<i32>} : memref<64x128xf32, #tpu.memory_space<vmem>>, vector<64x128xf32>,
    return
  }
  func.func @transform_0(%arg0: i32) -> (i32, i32) {
    %c0_i32 = arith.constant 0 : i32
    %c0_i32_0 = arith.constant 0 : i32
    return %arg0, %c0_i32 : i32, i32
  }
  func.func @transform_1(%arg0: i32) -> (i32, i32) {
    %c0_i32 = arith.constant 0 : i32
    %c0_i32_0 = arith.constant 0 : i32
    %c0_i32_1 = arith.constant 0 : i32
    return %c0_i32, %c0_i32_0 : i32, i32
  }
  func.func @transform_2(%arg0: i32) -> (i32, i32) {
    %c0_i32 = arith.constant 0 : i32
    %c0_i32_0 = arith.constant 0 : i32
    %c0_i32_1 = arith.constant 0 : i32
    return %c0_i32, %c0_i32_0 : i32, i32
  }
  func.func @transform_3(%arg0: i32) -> (i32, i32) {
    %c0_i32 = arith.constant 0 : i32
    %c0_i32_0 = arith.constant 0 : i32
    return %arg0, %c0_i32 : i32, i32
  }
}

</mosaic_0001>

<bundles_post_ra>
// kernel: tpu_custom_call.1
= control target key start
LH: loop header
LB: loop body
LE: loop exit
PB: predicated region body
PF: predicated region fallthrough
CT: control target
= control target key end

     0   :  { %s246_s0 = inlined_call_operand.vmem [shape: f32[64,32], index: 0, kind: input, shape index: {}]   ;;  %s247_s1 = inlined_call_operand.vmem [shape: f32[32,128], index: 1, kind: input, shape index: {}]   ;;  %s248_s2 = inlined_call_operand.vmem [shape: f32[1,128], index: 2, kind: input, shape index: {}]   ;;  %s249_s3 = inlined_call_operand.hbm [shape: f32[64,128], index: 3, kind: output, shape index: {}]  }
   0x1   :  { %v26_v0 = vld [vmem:[%s247_s1 + $0x18] sm:$0xff]  ;;  %v25_v1 = vld [vmem:[%s247_s1 + $0x10] sm:$0xff]  ;;  %v24_v2 = vld [vmem:[%s247_s1 + $0x8] sm:$0xff] }
   0x2   :  { %132 = vmatpush.msra.mxu2 %v26_v0  ;;  %133 = vmatpush.msra.mxu3 %v26_v0  ;;  %v23_v3 = vld [vmem:[%s247_s1] sm:$0xff] }
   0x3   :  { %68 = vmatpush.msra.mxu0 %v26_v0  ;;  %131 = vmatpush.msra.mxu1 %v26_v0 }
   0x4   :  { %135 = vmatpush.msra.mxu2 %v25_v1  ;;  %136 = vmatpush.msra.mxu3 %v25_v1 }
   0x5   :  { %69 = vmatpush.msra.mxu0 %v25_v1  ;;  %134 = vmatpush.msra.mxu1 %v25_v1 }
   0x6   :  { %8 = vsyncpa [#allocation3], 0  ;;  %138 = vmatpush.msra.mxu2 %v24_v2  ;;  %139 = vmatpush.msra.mxu3 %v24_v2  ;;  %v19_v4 = vld [vmem:[%s246_s0 + $0x20] sm:$0xff]  ;;  %vm31_vm0 = vcmask 261120   ;;  %v21_v5 = vld [vmem:[%s246_s0 + $0x30] sm:$0xff]  ;;  %s111_s12 = sshll.u32 %s249_s3, 4  ;;  %s112_s12 = int_to_ptr.hbm [resolvable:$true] %s111_s12 }
   0x7   :  { %70 = vmatpush.msra.mxu0 %v24_v2  ;;  %137 = vmatpush.msra.mxu1 %v24_v2  ;;  %v15_v6 = vld [vmem:[%s246_s0] sm:$0xff]  ;;  %v17_v7 = vld [vmem:[%s246_s0 + $0x10] sm:$0xff]  ;;  %v20_v8 = vld [vmem:[%s246_s0 + $0x28] sm:$0xff]  ;;  %s174_s13 = smov 128   ;;  %s175_s14 = smov 8  }
   0x8   :  { %141 = vmatpush.msra.mxu2 %v23_v3  ;;  %142 = vmatpush.msra.mxu3 %v23_v3  ;;  %v22_v9 = vld [vmem:[%s246_s0 + $0x38] sm:$0xff]  ;;  %v16_v10 = vld [vmem:[%s246_s0 + $0x8] sm:$0xff]  ;;  %v146_v12 = vld [vmem:[%s248_s2] ss:$0 sm:$0xff] }
   0x9   :  { %127 = vmatmul.msk.f32.vlgmr.msra.gmra.mxu2 %vm31_vm0, %v19_v4  ;;  %129 = vmatmul.msk.f32.vlgmr.msra.gmra.mxu3 %vm31_vm0, %v21_v5  ;;  %v18_v11 = vld [vmem:[%s246_s0 + $0x18] sm:$0xff]  ;;  %s173_s0 = smov [#allocation2]  }
   0xa   :  { %71 = vmatpush.msra.mxu0 %v23_v3  ;;  %140 = vmatpush.msra.mxu1 %v23_v3  ;;  %s109_s10 = sshll.u32 %s173_s0, 4  ;;  %s110_s10 = int_to_ptr.vmem [resolvable:$true] %s109_s10 }
   0xb   :  { %123 = vmatmul.msk.f32.vlgmr.msra.gmra.mxu0 %vm31_vm0, %v15_v6  ;;  %125 = vmatmul.msk.f32.vlgmr.msra.gmra.mxu1 %vm31_vm0, %v17_v7 }
  0x11   :  { %128 = vmatmul.msk.f32.gmra.mxu2 %vm31_vm0, %v20_v8  ;;  %130 = vmatmul.msk.f32.gmra.mxu3 %vm31_vm0, %v22_v9 }
  0x13   :  { %124 = vmatmul.msk.f32.gmra.mxu0 %vm31_vm0, %v16_v10  ;;  %126 = vmatmul.msk.f32.gmra.mxu1 %vm31_vm0, %v18_v11 }
  0x88   :  { %v73_v13 = vpop.f32.mrf.mxu0  ;;  %v79_v14 = vpop.f32.mrf.mxu1 }
  0x89   :  { %v74_v15 = vadd.f32 %v146_v12, %v73_v13  ;;  %v80_v16 = vadd.f32 %v146_v12, %v79_v14 }
  0x8b   :  { %97 = vst [vmem:[#allocation2] sm:$0xff] %v74_v15 }
  0x8c   :  { %99 = vst [vmem:[#allocation2 + $0x10] sm:$0xff] %v80_v16  ;;  %v85_v17 = vpop.f32.mrf.mxu2  ;;  %v91_v18 = vpop.f32.mrf.mxu3 }
  0x8d   :  { %v86_v19 = vadd.f32 %v146_v12, %v85_v17  ;;  %v92_v20 = vadd.f32 %v146_v12, %v91_v18 }
  0x8f   :  { %101 = vst [vmem:[#allocation2 + $0x20] sm:$0xff] %v86_v19 }
  0x90   :  { %103 = vst [vmem:[#allocation2 + $0x30] sm:$0xff] %v92_v20  ;;  %v76_v21 = vpop.f32.mrf.mxu0  ;;  %v82_v22 = vpop.f32.mrf.mxu1 }
  0x91   :  { %v77_v23 = vadd.f32 %v146_v12, %v76_v21  ;;  %v83_v24 = vadd.f32 %v146_v12, %v82_v22 }
  0x93   :  { %98 = vst [vmem:[#allocation2 + $0x8] sm:$0xff] %v77_v23 }
  0x94   :  { %100 = vst [vmem:[#allocation2 + $0x18] sm:$0xff] %v83_v24  ;;  %v88_v25 = vpop.f32.mrf.mxu2  ;;  %v94_v26 = vpop.f32.mrf.mxu3 }
  0x95   :  { %v89_v27 = vadd.f32 %v146_v12, %v88_v25  ;;  %v95_v28 = vadd.f32 %v146_v12, %v94_v26 }
  0x97   :  { %102 = vst [vmem:[#allocation2 + $0x28] sm:$0xff] %v89_v27 }
  0x98   :  { %104 = vst [vmem:[#allocation2 + $0x38] sm:$0xff] %v95_v28 }
  0x99   :  { %117 = dma.vmem_to_hbm [thread:$0]  %s110_s10, 1024, %s112_s12, [#allocation3], %s174_s13, %s174_s13, %s175_s14  }
  0x9a   :  { %171 = dma.done.wait [#allocation3], 1024  }
  0x9b   :  { %172 = vsyncadd [#allocation3], 4294966272 }
  0x9c   :  { %122 = vsyncpa [#allocation3], 1 }

</bundles_post_ra>
